<compile_context>
chip_gen: v6e
topology: v6e:2x2x1
jax: 0.10.0
libtpu: 0.0.40
codegen_flags: <defaults>
</compile_context>

<pallas_src>
import jax
import jax.numpy as jnp
from jax.experimental import pallas as pl
from jax.experimental.pallas import tpu as pltpu


def _round_up(x, m):
    return (x + m - 1) // m * m


# ----------------------------------------------------------------------------
# Kernel: one row-tile of the patch GEMM, bias fused, f32 accumulation.
# ----------------------------------------------------------------------------
def patch_embed_kernel(p_ref, w_ref, b_ref, o_ref):
    # p_ref: (TM, K_pad) bf16   w_ref: (K_pad, D) bf16   b_ref: (1, D) f32
    # o_ref: (TM, D) out_dtype  (D kept in lanes -> unmasked stores for D%128==0)
    acc = jnp.dot(p_ref[...], w_ref[...], preferred_element_type=jnp.float32)
    o_ref[...] = (acc + b_ref[...]).astype(o_ref.dtype)


# ----------------------------------------------------------------------------
# Host-side glue
# ----------------------------------------------------------------------------
def _extract_patches(x, patch_size, m_pad, k_pad, dtype):
    """(B, C, H, W) -> (m_pad, k_pad) bf16 patches, channel-major inside a
    patch (matches the flattened Conv2d weight layout).  The reshape /
    transpose / cast / pad chain sits in one XLA fusion: x is read once (f32)
    and the padded bf16 patches are written once."""
    B, C, H, W = x.shape
    p = patch_size
    hn, wn = H // p, W // p
    x = x.astype(dtype)
    x = x.reshape(B, C, hn, p, wn, p)
    x = jnp.transpose(x, (0, 2, 4, 1, 3, 5))        # (B, hn, wn, C, p, p)
    x = x.reshape(B * hn * wn, C * p * p)           # (M, K)
    M, K = x.shape
    if (m_pad, k_pad) != (M, K):
        x = jnp.pad(x, ((0, m_pad - M), (0, k_pad - K)))
    return x


def patch_embed(x, conv_w, conv_b, patch_size, *, row_tile=512,
                compute_dtype=jnp.bfloat16, out_dtype=jnp.bfloat16):
    """Forward pass of PatchEmbed.

    x:      (B, C, H, W) float32 (NCHW, like torch)
    conv_w: (D, C, p, p) float32 (torch Conv2d weight)
    conv_b: (D,)         float32 (torch Conv2d bias)
    returns (B, num_patches, D) in out_dtype (bf16 by default — the dtype the
            downstream ViT blocks consume; pass jnp.float32 to match torch).
    """
    B, C, H, W = x.shape
    p = patch_size
    assert H % p == 0 and W % p == 0, "image size must be divisible by patch"
    hn, wn = H // p, W // p
    P = hn * wn
    D = conv_w.shape[0]
    K = C * p * p
    K_pad = _round_up(K, 128)          # lane-aligned contraction dim
    M = B * P

    # Row tile: multiple of 16 (bf16 sublane packing); large by default
    # (512, a multiple of 256) to amortize per-step overhead; capped near M/2
    # so the parallel grid axis has >=2 steps for v7x's two TensorCores.
    TM = min(row_tile, max(16, _round_up(pl.cdiv(M, 2), 16)))
    M_pad = _round_up(M, TM)
    grid = (M_pad // TM,)

    # GEMM operands, feature dim D last (lanes).  Weight rows for the padded
    # K columns are zero, so the padded lanes contribute exactly 0.
    w = jnp.transpose(conv_w.reshape(D, K)).astype(compute_dtype)   # (K, D)
    if K_pad != K:
        w = jnp.pad(w, ((0, K_pad - K), (0, 0)))
    b = conv_b.reshape(1, D).astype(jnp.float32)

    patches = _extract_patches(x, p, M_pad, K_pad, compute_dtype)   # (M_pad, K_pad)

    out = pl.pallas_call(
        patch_embed_kernel,
        out_shape=jax.ShapeDtypeStruct((M_pad, D), out_dtype),
        grid=grid,
        in_specs=[
            # Row-tiled activations, double-buffered by the Pallas pipeline.
            pl.BlockSpec((TM, K_pad), lambda i: (i, 0)),
            # Weights + bias: whole array resident in VMEM (constant operands,
            # no per-step re-streaming).  ~K_pad*D*2 bytes -> tiny at ViT sizes
            # even under v7x's 64 MiB VMEM.
            pl.BlockSpec(memory_space=pltpu.MemorySpace.VMEM),
            pl.BlockSpec(memory_space=pltpu.MemorySpace.VMEM),
        ],
        out_specs=pl.BlockSpec((TM, D), lambda i: (i, 0)),
        compiler_params=pltpu.CompilerParams(
            dimension_semantics=("parallel",)),     # shard rows over v7x TCs
    )(patches, w, b)

    if M_pad != M:
        out = out[:M]
    return out.reshape(B, P, D)


# ----------------------------------------------------------------------------
if __name__ == "__main__":
    # Small shapes consistent with the module (img 16, patch 4, 3 channels);
    # embed_dim=128 keeps the output lane-dense.
    img_size, patch_size, in_chans, embed_dim = 16, 4, 3, 128
    B = 2

    key = jax.random.PRNGKey(0)
    kx, kw, kb = jax.random.split(key, 3)
    x = jax.random.normal(kx, (B, in_chans, img_size, img_size), jnp.float32)
    conv_w = jax.random.normal(
        kw, (embed_dim, in_chans, patch_size, patch_size), jnp.float32) * 0.02
    conv_b = jax.random.normal(kb, (embed_dim,), jnp.float32) * 0.02

    out = patch_embed(x, conv_w, conv_b, patch_size)
    out = jax.block_until_ready(out)

    # Pure-JAX reference: the actual strided conv WITH bias (the missing bias
    # in the reference was the sole cause of the previous check failure),
    # then flatten(2).transpose(1, 2) exactly like the torch module.
    ref = jax.lax.conv_general_dilated(
        x, conv_w, window_strides=(patch_size, patch_size), padding="VALID",
        dimension_numbers=("NCHW", "OIHW", "NCHW"),
        preferred_element_type=jnp.float32,
        precision=jax.lax.Precision.HIGHEST)
    ref = ref + conv_b[None, :, None, None]
    ref = ref.reshape(B, embed_dim, -1).transpose(0, 2, 1)

    num_patches = (img_size // patch_size) ** 2
    assert out.shape == (B, num_patches, embed_dim), out.shape
    assert out.dtype == jnp.bfloat16, out.dtype
    out_f32 = out.astype(jnp.float32)
    assert bool(jnp.all(jnp.isfinite(out_f32)))
    # bf16 MXU inputs + bf16 output store with f32 accumulation -> loose
    # tolerance vs. the f32 conv reference (observed error ~4e-3 max).
    assert bool(jnp.allclose(out_f32, ref, rtol=2e-2, atol=2e-2)), \
        float(jnp.max(jnp.abs(out_f32 - ref)))
    print("KERNEL_OK")
</pallas_src>

<mosaic_0001>
module attributes {stable_mosaic.version = 11 : i64} {
  func.func @patch_embed_kernel(%arg0: i32, %arg1: memref<16x128xbf16, #tpu.memory_space<vmem>>, %arg2: memref<128x128xbf16, #tpu.memory_space<vmem>>, %arg3: memref<1x128xf32, #tpu.memory_space<vmem>>, %arg4: memref<16x128xbf16, #tpu.memory_space<vmem>>) attributes {dimension_semantics = [#tpu.dimension_semantics<parallel>], iteration_bounds = array<i64: 2>, scalar_prefetch = 0 : i64, scratch_operands = 0 : i64, tpu.core_type = #tpu.core_type<tc>, window_params = [{transform_indices = @transform_0, window_bounds = array<i64: 16, 128>}, {pipeline_mode = #tpu.pipeline_mode<synchronous>, transform_indices = @transform_1, window_bounds = array<i64: 128, 128>}, {pipeline_mode = #tpu.pipeline_mode<synchronous>, transform_indices = @transform_2, window_bounds = array<i64: 1, 128>}, {transform_indices = @transform_3, window_bounds = array<i64: 16, 128>}]} {
    %c0 = arith.constant 0 : index
    %c0_0 = arith.constant 0 : index
    %0 = vector.load %arg1[%c0, %c0_0] : memref<16x128xbf16, #tpu.memory_space<vmem>>, vector<16x128xbf16>
    %c0_1 = arith.constant 0 : index
    %c0_2 = arith.constant 0 : index
    %1 = vector.load %arg2[%c0_1, %c0_2] : memref<128x128xbf16, #tpu.memory_space<vmem>>, vector<128x128xbf16>
    %cst = arith.constant dense<0.000000e+00> : vector<16x128xf32>
    %2 = tpu.matmul %0, %1, %cst {dimension_numbers = #tpu.dot_dimension_numbers<[1], [0], [0], [1], [0, 0, 1, 1], [], []>} : vector<16x128xbf16>, vector<128x128xbf16>, vector<16x128xf32> -> vector<16x128xf32>
    %c0_3 = arith.constant 0 : index
    %c0_4 = arith.constant 0 : index
    %3 = vector.load %arg3[%c0_3, %c0_4] : memref<1x128xf32, #tpu.memory_space<vmem>>, vector<1x128xf32>
    %4 = vector.broadcast %3 : vector<1x128xf32> to vector<16x128xf32>
    %5 = arith.addf %2, %4 : vector<16x128xf32>
    %6 = arith.truncf %5 : vector<16x128xf32> to vector<16x128xbf16>
    %c0_5 = arith.constant 0 : index
    %c0_6 = arith.constant 0 : index
    %7 = vector.load %arg4[%c0_5, %c0_6] : memref<16x128xbf16, #tpu.memory_space<vmem>>, vector<16x128xbf16>
    tpu.vector_store %arg4[%c0_5, %c0_6], %6 {strides = array<i32>} : memref<16x128xbf16, #tpu.memory_space<vmem>>, vector<16x128xbf16>,
    return
  }
  func.func @transform_0(%arg0: i32) -> (i32, i32) {
    %c0_i32 = arith.constant 0 : i32
    %c0_i32_0 = arith.constant 0 : i32
    return %arg0, %c0_i32 : i32, i32
  }
  func.func @transform_1(%arg0: i32) -> (i32, i32) {
    %c0_i32 = arith.constant 0 : i32
    %c0_i32_0 = arith.constant 0 : i32
    %c0_i32_1 = arith.constant 0 : i32
    return %c0_i32, %c0_i32_0 : i32, i32
  }
  func.func @transform_2(%arg0: i32) -> (i32, i32) {
    %c0_i32 = arith.constant 0 : i32
    %c0_i32_0 = arith.constant 0 : i32
    %c0_i32_1 = arith.constant 0 : i32
    return %c0_i32, %c0_i32_0 : i32, i32
  }
  func.func @transform_3(%arg0: i32) -> (i32, i32) {
    %c0_i32 = arith.constant 0 : i32
    %c0_i32_0 = arith.constant 0 : i32
    return %arg0, %c0_i32 : i32, i32
  }
}

</mosaic_0001>

<bundles_post_ra>
// kernel: tpu_custom_call.1
= control target key start
LH: loop header
LB: loop body
LE: loop exit
PB: predicated region body
PF: predicated region fallthrough
CT: control target
= control target key end

     0   :  { %8 = vsyncpa [#allocation3], 0  ;;  %s918_s0 = inlined_call_operand.hbm [shape: bf16[32,128], index: 0, kind: input, shape index: {}]   ;;  %s919_s1 = inlined_call_operand.hbm [shape: bf16[128,128], index: 1, kind: input, shape index: {}]   ;;  %s920_s2 = inlined_call_operand.vmem [shape: f32[1,128], index: 2, kind: input, shape index: {}]   ;;  %s921_s3 = inlined_call_operand.hbm [shape: bf16[32,128], index: 3, kind: output, shape index: {}]  }
   0x1   :  { %10 = vsyncpa [#allocation3 + $0x1], 0 }
   0x2   :  { %11 = vsyncpa [#allocation6], 0 }
   0x3   :  { %12 = vsyncpa [#allocation4], 0 }
   0x4   :  { %14 = vsyncpa [#allocation4 + $0x1], 0  ;;  %s725_s12 = smov 0   ;;  %s727_s13 = smov 0  }
   0x5   :  { %s729_s14 = smov 0   ;;  %s731_s15 = smov 0  }
   0x6 LB: > { %s746_s16 = sadd.s32 4294967295, %s694_s15   ;;  %s434_s17 = sadd.s32 4294967294, %s694_s15   ;;  %s694_s15 = sphi %s731_s15, %s943_s15   ;;  %s690_s14 = sphi %s729_s14, %s942_s14   ;;  %s686_s13 = sphi %s727_s13, %s941_s13   ;;  %s682_s12 = sphi %s725_s12, %s940_s12  }
   0x7   : > { %p40_p0 = scmp.ne.s32.totalorder %s686_s13, %s682_s12  ;;  %p922_p1 = scmp.eq.s32.totalorder %s746_s16, 0 }
   0x8   : > { %p112_p3 = scmp.eq.s32.totalorder %s434_s17, 1  ;;  %p435_p5 = scmp.ge.s32.totalorder %s694_s15, 1 }
   0x9   : > { %p755_p4 = por %p922_p1, %p40_p0  ;;  %p119_p7 = scmp.lt.s32.totalorder %s694_s15, 3 }
   0xa   : > { %p760_p6 = por %p112_p3, %p40_p0  ;;  %s696_s21 = smov [#allocation5]  }
   0xb   : > { %s926_s18 = scalar_select %p755_p4, 1, 0 }
   0xc   : > { %s927_s19 = scalar_select %p760_p6, 1, 0 }
   0xd   : > { %p765_p8 = pnand %p435_p5, %p119_p7  ;;  %s131_s22 = sshll.u32 %s696_s21, 4  ;;  %s132_s22 = int_to_ptr.vmem [resolvable:$true] %s131_s22 }
   0xe   : > { %s779_s24 = sadd.s32 1, %s694_s15   ;;  %s27_s25 = sadd.s32 1, %s690_s14 }
   0xf   : > { %s928_s20 = scalar_select %p765_p8, 1, 0 }
  0x10   : > { %p508_p9 = pneg %p765_p8  ;;  %s24_s26 = ssub.s32 %s694_s15, %s779_s24 }
  0x11   : > { %s583_s27 = scalar_lea.vmem %s132_s22, 1024  ;;  %p591_p5 = scmp.lt.s32.totalorder %s132_s22, %s132_s22 }
  0x12   : > { %p774_p11 = pnand %p508_p9, %p922_p1  ;;  %p584_p13 = scmp.ne.s32.totalorder %s132_s22, %s583_s27 }
  0x13   : > { %p592_p7 = scmp.lt.s32.totalorder %s583_s27, %s583_s27 }
  0x14   : > { %p574_p12 = pneg %p774_p11 }
  0x15   : > { %p593_p10 = por %p592_p7, %p591_p5 }
  0x16   : > { %p586_p0 = pnand %p584_p13, %p574_p12 }
  0x18   : > { %p587_p3 = pneg %p586_p0 }
  0x1a   : > { %p594_p2 = pnand %p593_p10, %p587_p3 }
  0x1c   : > { %597 = shalt.err (!%p594_p2)
}
  0x1d   : > { %s697_s28 = smov 64   ;;  %s698_s29 = smov 4  }
  0x1e   : > { %511 = dma.hbm_to_vmem [thread:$0]  (!%p774_p11), %s919_s1, 1024, %s132_s22, [#allocation6], %s697_s28, %s697_s28, %s698_s29  }
  0x1f   : > { %p25_p2 = scmp.eq.s32.totalorder %s24_s26, 0  ;;  %p34_p9 = scmp.ne.s32.totalorder %s690_s14, %s686_s13 }
  0x20   : > { %p35_p10 = scmp.eq.s32.totalorder %s694_s15, 0  ;;  %p521_p12 = scmp.lt.s32.totalorder %s694_s15, 2 }
  0x21   : > { %s799_s5 = scalar_select %p25_p2, %s690_s14, %s27_s25  }
  0x22   : > { %p36_p13 = por %p35_p10, %p34_p9  ;;  %p930_p0 = scmp.eq.s32.totalorder %s746_s16, 1 }
  0x23   : > { %s148_s7 = sand.u32 1, %s690_s14   ;;  %s462_s8 = sshll.u32 %s694_s15, 7 }
  0x24   : > { %p803_p3 = por %p930_p0, %p34_p9  ;;  %s438_s9 = sshll.u32 %s148_s7, 3 }
  0x25   : > { %s812_s17 = scalar_lea.hbm %s918_s0, %s462_s8  ;;  %s152_s21 = scalar_lea.vmem [#allocation2], %s438_s9 }
  0x26   : > { %s931_s6 = scalar_select %p803_p3, 1, 0 }
  0x27   : > { %s159_s22 = sshll.u32 %s152_s21, 4  ;;  %p814_p11 = pnand %p521_p12, %p36_p13  ;;  %s818_s22 = int_to_ptr.vmem [resolvable:$true] %s159_s22 }
  0x28   : > { %s820_s25 = scalar_lea.sflag [#allocation3], %s148_s7  ;;  %s598_s26 = scalar_lea.hbm %s812_s17, 128 }
  0x29   : > { %p599_p5 = scmp.ne.s32.totalorder %s812_s17, %s598_s26  ;;  %p600_p7 = pneg %p814_p11 }
  0x2a   : > { %s603_s4 = scalar_lea.hbm %s918_s0, 256  ;;  %p604_p10 = scmp.lt.s32.totalorder %s812_s17, %s918_s0 }
  0x2b   : > { %p601_p2 = pnand %p600_p7, %p599_p5  ;;  %p605_p12 = scmp.lt.s32.totalorder %s603_s4, %s598_s26 }
  0x2d   : > { %p602_p9 = pneg %p601_p2  ;;  %p606_p13 = por %p605_p12, %p604_p10 }
  0x2f   : > { %p607_p0 = pnand %p606_p13, %p602_p9 }
  0x31   : > { %610 = shalt.err (!%p607_p0)
}
  0x32   : > { %s611_s7 = scalar_lea.vmem %s818_s22, 128  ;;  %s699_s10 = smov [#allocation2]  }
  0x33   : > { %p612_p1 = scmp.ne.s32.totalorder %s818_s22, %s611_s7  ;;  %s616_s11 = sshll.u32 %s699_s10, 4  ;;  %s617_s11 = int_to_ptr.vmem [resolvable:$false] %s616_s11 }
  0x34   : > { %s618_s21 = scalar_lea.vmem %s617_s11, 256  ;;  %p619_p2 = scmp.lt.s32.totalorder %s818_s22, %s617_s11 }
  0x35   : > { %p614_p6 = pnand %p612_p1, %p600_p7  ;;  %p620_p3 = scmp.lt.s32.totalorder %s618_s21, %s611_s7 }
  0x37   : > { %p615_p5 = pneg %p614_p6  ;;  %p621_p4 = por %p620_p3, %p619_p2 }
  0x39   : > { %p622_p8 = pnand %p621_p4, %p615_p5 }
  0x3b   : > { %625 = shalt.err (!%p622_p8)
}
  0x3c   : > { %515 = dma.hbm_to_vmem [thread:$0]  (!%p814_p11), %s812_s17, 128, %s818_s22, %s820_s25, %s697_s28, %s697_s28, %s698_s29  }
  0x3d   : > { %p933_p1 = scmp.ne.s32.totalorder %s928_s20, 0 }
  0x3e   : > { %s847_s26 = sand.u32 (!%p933_p1), 1, %s686_s13   ;;  %p934_p4 = scmp.ne.s32.totalorder (!%p933_p1), %s926_s18, 0 }
  0x3f   : > { %171 = sbr.rel (%p933_p1) target bundleno = 320 (0x140), region = 32  ;;  %s442_s27 = sshll.u32 (!%p933_p1), %s847_s26, 3 }
  0x40   : > { %s174_s30 = scalar_lea.sflag (!%p933_p1), [#allocation3], %s847_s26  ;;  %s853_s23 = scalar_lea.vmem (!%p933_p1), [#allocation2], %s442_s27 }
  0x44   : > { %669 = dma.done.wait (%p934_p4), %s174_s30, 128  }
  0x45   : > { %671 = vsyncadd (%p934_p4), %s174_s30, 4294967168  ;;  %p935_p6 = scmp.eq.s32.totalorder %s746_s16, 0 }
  0x47   : > { %673 = dma.done.wait (%p935_p6), [#allocation6], 1024   ;;  %p936_p8 = pmov %p935_p6 }
  0x48   : > { %v700_v0 = vmov 0.0   ;;  %vm701_vm0 = vmmov 0   ;;  %v563_v1 = vld [vmem:[#allocation5 + $0x38] sm:$0xff]   ;;  %v564_v2 = vld [vmem:[#allocation5 + $0x30] sm:$0xff]   ;;  %v565_v3 = vld [vmem:[#allocation5 + $0x28] sm:$0xff]   ;;  %s203_s28 = scalar_lea.vmem [#allocation7], %s442_s27 }
  0x49   : > { %675 = vsyncadd (%p936_p8), [#allocation6], 4294966272  ;;  %480 = vmatprep.subr.bf16.mxu0 %v700_v0  ;;  %496 = vmatprep.mubr.msk.bf16.mxu0 %vm701_vm0, %v700_v0  ;;  %v566_v4 = vld [vmem:[#allocation5 + $0x20] sm:$0xff]   ;;  %v567_v5 = vld [vmem:[#allocation5 + $0x18] sm:$0xff]   ;;  %s351_s29 = sshll.u32 %s203_s28, 4  ;;  %s465_s17 = sshll.u32 %s746_s16, 7  ;;  %s870_s29 = int_to_ptr.vmem [resolvable:$true] %s351_s29 }
  0x4a   : > { %481 = vmatpush3.bf16.msra.mxu0 %v563_v1  ;;  %v568_v6 = vld [vmem:[#allocation5 + $0x10] sm:$0xff]   ;;  %v569_v7 = vld [vmem:[#allocation5 + $0x8] sm:$0xff]   ;;  %v570_v8 = vld [vmem:[#allocation5] sm:$0xff]   ;;  %s875_s4 = scalar_lea.hbm %s921_s3, %s465_s17  ;;  %s338_s8 = scalar_lea.sflag [#allocation4], %s847_s26 }
  0x4b   : > { %482 = vmatprep.subr.bf16.mxu0 %v700_v0  ;;  %v571_v9 = vld [vmem:[%s853_s23] sm:$0xff]   ;;  %s626_s9 = scalar_lea.vmem %s870_s29, 128  ;;  %p937_p11 = scmp.ne.s32.totalorder %s931_s6, 0 }
  0x4c   : > { %v445_v11 = vld [vmem:[%s920_s2] ss:$0 sm:$0xff]  ;;  %p627_p3 = scmp.ne.s32.totalorder %s870_s29, %s626_s9  ;;  %s702_s16 = smov [#allocation7]  }
  0x4d   : > { %s630_s7 = sshll.u32 %s702_s16, 4  ;;  %s631_s7 = int_to_ptr.vmem [resolvable:$false] %s630_s7 }
  0x4e   : > { %483 = vmatpush3.bf16.msra.mxu0 %v564_v2  ;;  %p628_p7 = pnand %p627_p3, %p937_p11  ;;  %s632_s10 = scalar_lea.vmem %s631_s7, 256 }
  0x4f   : > { %484 = vmatprep.subr.bf16.mxu0 %v700_v0  ;;  %p633_p10 = scmp.lt.s32.totalorder %s870_s29, %s631_s7  ;;  %p634_p12 = scmp.lt.s32.totalorder %s632_s10, %s626_s9 }
  0x50   : > { %p629_p9 = pneg %p628_p7 }
  0x51   : > { %p635_p13 = por %p634_p12, %p633_p10 }
  0x52   : > { %485 = vmatpush3.bf16.msra.mxu0 %v565_v3 }
  0x53   : > { %486 = vmatprep.subr.bf16.mxu0 %v700_v0  ;;  %p636_p0 = pnand %p635_p13, %p629_p9 }
  0x56   : > { %487 = vmatpush3.bf16.msra.mxu0 %v566_v4 }
  0x57   : > { %488 = vmatprep.subr.bf16.mxu0 %v700_v0 }
  0x5a   : > { %489 = vmatpush3.bf16.msra.mxu0 %v567_v5 }
  0x5b   : > { %490 = vmatprep.subr.bf16.mxu0 %v700_v0 }
  0x5e   : > { %491 = vmatpush3.bf16.msra.mxu0 %v568_v6 }
  0x5f   : > { %492 = vmatprep.subr.bf16.mxu0 %v700_v0 }
  0x62   : > { %493 = vmatpush3.bf16.msra.mxu0 %v569_v7 }
  0x63   : > { %494 = vmatprep.subr.bf16.mxu0 %v700_v0 }
  0x66   : > { %495 = vmatpush3.bf16.msra.mxu0 %v570_v8 }
  0x69   : > { %497 = vmatmul.mubr.bf16.vlgmr.msra.gmra.mxu0 %v571_v9 }
 0x129   : > { %v320_v10 = vpop.f32.mrf.mxu0 }
 0x12a   : > { %v321_v14 = vadd.f32 %v445_v11, %v320_v10 }
 0x12b   : > { %v498_v12 = vpop.f32.mrf.mxu0 }
 0x12d   : > { %v323_v13 = vpop.f32.mrf.mxu0 }
 0x12e   : > { %v324_v15 = vadd.f32 %v445_v11, %v323_v13 }
 0x12f   : > { %v499_v16 = vpop.f32.mrf.mxu0 }
 0x130   : > { %v469_v17 = vpack.c.bf16 %v324_v15, %v321_v14 }
 0x132   : > { %470 = vst [vmem:[%s203_s28] sm:$0xff] %v469_v17  }
 0x133   : > { %639 = shalt.err (!%p636_p0)
}
 0x134   : > { %s640_s11 = scalar_lea.hbm %s875_s4, 128  ;;  %s644_s30 = scalar_lea.hbm %s921_s3, 256 }
 0x135   : > { %p641_p5 = scmp.ne.s32.totalorder %s875_s4, %s640_s11  ;;  %p645_p4 = scmp.lt.s32.totalorder %s875_s4, %s921_s3 }
 0x136   : > { %p646_p6 = scmp.lt.s32.totalorder %s644_s30, %s640_s11 }
 0x137   : > { %p642_p2 = pnand %p641_p5, %p937_p11 }
 0x138   : > { %p647_p8 = por %p646_p6, %p645_p4 }
 0x139   : > { %p643_p1 = pneg %p642_p2 }
 0x13b   : > { %p648_p3 = pnand %p647_p8, %p643_p1 }
 0x13d   : > { %651 = shalt.err (!%p648_p3)
}
 0x13e   : > { %s703_s20 = smov 64   ;;  %s704_s28 = smov 4  }
 0x13f   : > { %506 = dma.vmem_to_hbm [thread:$0]  (%p937_p11), %s870_s29, 128, %s875_s4, %s338_s8, %s703_s20, %s703_s20, %s704_s28  }
 0x140 PF: > { %s366_s17 = sand.u32 1, %s682_s12   ;;  %p938_p7 = scmp.ne.s32.totalorder %s927_s19, 0 }
 0x141   : > { %p939_p9 = scmp.ge.s32.totalorder %s694_s15, 2  ;;  %s367_s22 = scalar_lea.sflag [#allocation4], %s366_s17 }
 0x143   : > { %p517_p10 = pnand %p939_p9, %p938_p7 }
 0x145   : > { %p518_p12 = pneg %p517_p10 }
 0x147   : > { %677 = dma.done.wait (%p518_p12), %s367_s22, 128  }
 0x148   : > { %679 = vsyncadd (%p518_p12), %s367_s22, 4294967168  ;;  %p17_p13 = scmp.ge.s32.totalorder %s779_s24, 4   ;;  %s940_s12 = smov %s686_s13 }
 0x149   : > { %s941_s13 = smov %s690_s14  ;;  %s942_s14 = smov %s799_s5 }
 0x14a   : > { %s943_s15 = smov %s779_s24  ;;  %19 = sbr.rel (!%p17_p13) target bundleno = 6 (0x6), region = 81 }
 0x14f   :  { %372 = vsyncpa [#allocation3], 1 }
 0x150   :  { %374 = vsyncpa [#allocation3 + $0x1], 1 }
 0x151   :  { %375 = vsyncpa [#allocation6], 1 }
 0x152   :  { %376 = vsyncpa [#allocation4], 1 }
 0x153   :  { %378 = vsyncpa [#allocation4 + $0x1], 1 }

</bundles_post_ra>
